<compile_context>
chip_gen: v7x
topology: tpu7x:2x2x1
jax: 0.10.0
libtpu: 0.0.40
codegen_flags: <defaults>
</compile_context>

<pallas_src>
import functools

import numpy as np
import jax
import jax.numpy as jnp
from jax import lax
from jax.experimental import pallas as pl
from jax.experimental.pallas import tpu as pltpu

_BIG = 1e30  # finite +/- "infinity" sentinel for masked min/max


def _mvr_ms_reg_kernel(lab_col_ref, lab_row_ref, sqn_row_ref, emb_ref, out_ref, *,
                       tm, b_actual, scale_pos, scale_neg, thresh, margin, gamma):
    i = pl.program_id(0)
    row0 = pl.multiple_of(i * tm, tm)
    eps = 1e-5

    emb_full = emb_ref[...]                         # (Bp, D) f32, resident across grid
    emb_tile = emb_ref[pl.ds(row0, tm), :]          # (tm, D) anchor rows for this tile
    lab_c = lab_col_ref[...]                        # (tm, 1) i32
    lab_r = lab_row_ref[...]                        # (1, Bp) i32
    sq_r = sqn_row_ref[...]                         # (1, Bp) f32: ||e_j||^2
    bp = emb_full.shape[0]

    # Gram slab on the MXU: G[a, j] = <e_anchor_a, e_j>
    G = lax.dot_general(emb_tile, emb_full, (((1,), (1,)), ((), ())),
                        preferred_element_type=jnp.float32)             # (tm, Bp)

    # ||e_anchor||^2 from the tile itself (O(tm*D) VPU work, no (B,B) diagonal mask)
    diag_c = jnp.sum(emb_tile * emb_tile, axis=1, keepdims=True)         # (tm, 1)

    col_iota = lax.broadcasted_iota(jnp.int32, (tm, bp), 1)
    valid_col = col_iota < b_actual                                      # mask batch padding

    same = lab_c == lab_r                                                # (tm, Bp)
    pos_mask = jnp.logical_and(jnp.logical_and(same, G < 1.0 - eps), valid_col)
    neg_mask = jnp.logical_and(jnp.logical_not(same), valid_col)

    min_pos = jnp.min(jnp.where(pos_mask, G, _BIG), axis=1, keepdims=True)
    max_neg = jnp.max(jnp.where(neg_mask, G, -_BIG), axis=1, keepdims=True)

    # margin-mined pair sets
    neg_sel = jnp.logical_and(neg_mask, (G + margin) > min_pos)
    pos_sel = jnp.logical_and(pos_mask, (G - margin) < max_neg)

    # hardest (lowest-similarity) selected positive: first argmin as a one-hot row
    masked_pos = jnp.where(pos_sel, G, _BIG)
    min_sel = jnp.min(masked_pos, axis=1, keepdims=True)                 # (tm, 1)
    has_pos = min_sel < 0.5 * _BIG                                       # pos_sel non-empty
    has_neg = jnp.logical_and(max_neg > -0.5 * _BIG,
                              (max_neg + margin) > min_pos)              # neg_sel non-empty

    iota_f = col_iota.astype(jnp.float32)
    is_min = jnp.logical_and(pos_sel, masked_pos == min_sel)             # f32 exact compare
    first_idx = jnp.min(jnp.where(is_min, iota_f, float(bp)), axis=1, keepdims=True)
    onehot = (iota_f == first_idx).astype(jnp.float32)                   # (tm, Bp); all-zero row if no positive

    # Hardest-positive gather, factored through the embedding (O(tm*Bp*D), not O(tm*Bp^2)).
    emb_p = lax.dot_general(onehot, emb_full, (((1,), (0,)), ((), ())),
                            preferred_element_type=jnp.float32)          # (tm, D): e_{p(a)}
    G_pj = lax.dot_general(emb_p, emb_full, (((1,), (1,)), ((), ())),
                           preferred_element_type=jnp.float32)           # (tm, Bp): G[p(a), j]
    G_ip = jnp.where(has_pos, min_sel, 0.0)                              # (tm, 1): G[a, p(a)]
    G_pp = jnp.sum(emb_p * emb_p, axis=1, keepdims=True)                 # (tm, 1): ||e_p||^2

    # reg = gamma * cos(f_n - f_a, f_p - f_a), in Gram-matrix terms, single rsqrt.
    num = G_pj - G - G_ip + diag_c                                       # <f_n - f_a, f_p - f_a>
    d_ni_sq = sq_r - 2.0 * G + diag_c                                    # ||f_n - f_a||^2
    d_pi_sq = G_pp - 2.0 * G_ip + diag_c                                 # ||f_p - f_a||^2
    inv_denom = lax.rsqrt(jnp.maximum(d_ni_sq, 1e-16) * jnp.maximum(d_pi_sq, 1e-16))
    reg = gamma * num * inv_denom                                        # (tm, Bp)

    # multi-similarity terms (masked sums reproduce the variable-length pair lists)
    pos_exp = jnp.where(pos_sel, jnp.exp(-scale_pos * (G - thresh)), 0.0)
    pos_loss = (1.0 / scale_pos) * jnp.log(1.0 + jnp.sum(pos_exp, axis=1, keepdims=True))
    neg_arg = jnp.minimum(scale_neg * (G - thresh - reg), 80.0)          # overflow hardening
    neg_exp = jnp.where(neg_sel, jnp.exp(neg_arg), 0.0)
    neg_loss = (1.0 / scale_neg) * jnp.log(1.0 + jnp.sum(neg_exp, axis=1, keepdims=True))

    # "continue" in the torch loop + batch-padding mask: those anchors contribute 0.
    row_iota = lax.broadcasted_iota(jnp.int32, (tm, 1), 0)
    valid_anchor = (row0 + row_iota) < b_actual
    keep = jnp.logical_and(jnp.logical_and(has_pos, has_neg), valid_anchor)
    out_ref[...] = jnp.where(keep, pos_loss + neg_loss, 0.0)             # (tm, 1)


def mvr_ms_reg(embeddings, labels, *, scale_pos=2.0, scale_neg=50.0,
               thresh=0.7, margin=0.1, gamma=0.3, tile_m=None):
    """Forward pass of MVR_MS_reg. embeddings: (B, D) float, labels: (B,) int."""
    B, D = embeddings.shape

    # Anchor-row tile size (multiple of 8 sublanes). 128 keeps the (tm, B) slab
    # temporaries within the v7x 64 MiB VMEM budget at realistic batch sizes.
    if tile_m is None:
        tm = ((B + 7) // 8) * 8 if B <= 128 else 128
    else:
        assert tile_m % 8 == 0, "tile_m must be a multiple of 8 (sublanes)"
        tm = tile_m
    Bp = ((B + tm - 1) // tm) * tm
    num_tiles = Bp // tm
    pad_b = Bp - B

    emb = jnp.pad(embeddings.astype(jnp.float32), ((0, pad_b), (0, 0)))
    lab = jnp.pad(labels.astype(jnp.int32), (0, pad_b))
    sqn = jnp.sum(emb * emb, axis=1)                                     # ||e_j||^2, once
    lab_col = lab.reshape(Bp, 1)
    lab_row = lab.reshape(1, Bp)
    sqn_row = sqn.reshape(1, Bp)

    # Explicit VMEM budget (resident embeddings + ~16 live (tm, Bp) f32 slab temps).
    slab_bytes = 16 * tm * Bp * 4
    resident_bytes = 2 * (Bp * D * 4 + 3 * Bp * 4 + tm * 4)
    vmem_limit = int(max(32 * 1024 * 1024,
                         min(slab_bytes + resident_bytes + (8 << 20), 120 * 1024 * 1024)))

    kernel = functools.partial(
        _mvr_ms_reg_kernel, tm=tm, b_actual=B, scale_pos=scale_pos,
        scale_neg=scale_neg, thresh=thresh, margin=margin, gamma=gamma)

    per_anchor = pl.pallas_call(
        kernel,
        out_shape=jax.ShapeDtypeStruct((Bp, 1), jnp.float32),
        grid=(num_tiles,),
        in_specs=[
            pl.BlockSpec((tm, 1), lambda i: (i, 0)),    # anchor labels (tiled)
            pl.BlockSpec((1, Bp), lambda i: (0, 0)),    # all labels (resident)
            pl.BlockSpec((1, Bp), lambda i: (0, 0)),    # squared norms (resident)
            pl.BlockSpec((Bp, D), lambda i: (0, 0)),    # embeddings (resident)
        ],
        out_specs=pl.BlockSpec((tm, 1), lambda i: (i, 0)),
        compiler_params=pltpu.CompilerParams(
            dimension_semantics=("parallel",),
            vmem_limit_bytes=vmem_limit),
    )(lab_col, lab_row, sqn_row, emb)

    return jnp.sum(per_anchor) / float(B)


def _reference_loss(emb, labels, scale_pos=2.0, scale_neg=50.0,
                    thresh=0.7, margin=0.1, gamma=0.3):
    """Literal numpy translation of the PyTorch per-anchor loop (for checking)."""
    emb = np.asarray(emb, dtype=np.float64)
    labels = np.asarray(labels)
    B = emb.shape[0]
    sim = emb @ emb.T
    eps = 1e-5
    losses = []
    for i in range(B):
        pos_lab = labels == labels[i]
        pos_all = sim[i][pos_lab]
        eps_mask = pos_all < 1.0 - eps
        pos_ = pos_all[eps_mask]
        neg_lab = labels != labels[i]
        neg_ = sim[i][neg_lab]
        if pos_.size == 0 or neg_.size == 0:
            continue
        neg_m = neg_ + margin > pos_.min()
        pos_m = pos_ - margin < neg_.max()
        neg_pair = neg_[neg_m]
        pos_pair = pos_[pos_m]
        if len(neg_pair) < 1 or len(pos_pair) < 1:
            continue
        pos_orig = np.nonzero(pos_lab)[0][eps_mask][pos_m]
        p_idx = pos_orig[np.argmin(pos_pair)]
        neg_orig = np.nonzero(neg_lab)[0][neg_m]
        f_n = emb[neg_orig]
        f_a = emb[i]
        f_p = emb[p_idx]
        a = f_n - f_a
        b = f_p - f_a
        cos = (a * b).sum(-1) / (np.maximum(np.linalg.norm(a, axis=-1), 1e-8)
                                 * np.maximum(np.linalg.norm(b), 1e-8))
        reg = gamma * cos
        pos_loss = 1.0 / scale_pos * np.log(
            1.0 + np.sum(np.exp(-scale_pos * (pos_pair - thresh))))
        neg_loss = 1.0 / scale_neg * np.log(
            1.0 + np.sum(np.exp(scale_neg * (neg_pair - thresh - reg))))
        losses.append(pos_loss + neg_loss)
    if not losses:
        return 0.0
    return float(sum(losses) / B)


if __name__ == "__main__":
    key = jax.random.PRNGKey(0)
    k1, k2 = jax.random.split(key)

    # Test 1: B=16, D=32, tile_m=8 -> a 2-step grid with a label group crossing
    # the tile boundary (typical metric-learning usage: L2-normalized embeddings).
    B, D = 16, 32
    emb = jax.random.normal(k1, (B, D), dtype=jnp.float32)
    emb = emb / jnp.linalg.norm(emb, axis=1, keepdims=True)
    labels = jnp.array([0, 0, 0, 1, 1, 1, 2, 2, 2, 3, 3, 3, 4, 4, 4, 4],
                       dtype=jnp.int32)
    loss = jax.block_until_ready(mvr_ms_reg(emb, labels, tile_m=8))
    ref = _reference_loss(np.asarray(emb), np.asarray(labels))
    assert np.isfinite(float(loss))
    np.testing.assert_allclose(float(loss), ref, rtol=5e-3, atol=1e-5)

    # Test 2: B=12 (not a multiple of 8) -> exercises the in-wrapper batch padding
    # and the in-kernel validity masks, with the automatic tile size.
    B2 = 12
    emb2 = jax.random.normal(k2, (B2, D), dtype=jnp.float32)
    emb2 = emb2 / jnp.linalg.norm(emb2, axis=1, keepdims=True)
    labels2 = jnp.array([0, 0, 0, 1, 1, 1, 2, 2, 2, 3, 3, 3], dtype=jnp.int32)
    loss2 = jax.block_until_ready(mvr_ms_reg(emb2, labels2))
    ref2 = _reference_loss(np.asarray(emb2), np.asarray(labels2))
    assert np.isfinite(float(loss2))
    np.testing.assert_allclose(float(loss2), ref2, rtol=5e-3, atol=1e-5)

    print("KERNEL_OK")
</pallas_src>

<mosaic_0001>
module attributes {stable_mosaic.version = 11 : i64} {
  func.func @_mvr_ms_reg_kernel(%arg0: i32, %arg1: memref<8x1xi32, #tpu.memory_space<vmem>>, %arg2: memref<1x16xi32, #tpu.memory_space<vmem>>, %arg3: memref<1x16xf32, #tpu.memory_space<vmem>>, %arg4: memref<16x32xf32, #tpu.memory_space<vmem>>, %arg5: memref<8x1xf32, #tpu.memory_space<vmem>>) attributes {dimension_semantics = [#tpu.dimension_semantics<parallel>], iteration_bounds = array<i64: 2>, scalar_prefetch = 0 : i64, scratch_operands = 0 : i64, tpu.core_type = #tpu.core_type<tc>, window_params = [{transform_indices = @transform_0, window_bounds = array<i64: 8, 1>}, {pipeline_mode = #tpu.pipeline_mode<synchronous>, transform_indices = @transform_1, window_bounds = array<i64: 1, 16>}, {pipeline_mode = #tpu.pipeline_mode<synchronous>, transform_indices = @transform_2, window_bounds = array<i64: 1, 16>}, {pipeline_mode = #tpu.pipeline_mode<synchronous>, transform_indices = @transform_3, window_bounds = array<i64: 16, 32>}, {transform_indices = @transform_4, window_bounds = array<i64: 8, 1>}]} {
    %c8_i32 = arith.constant 8 : i32
    %0 = arith.muli %arg0, %c8_i32 : i32
    %1 = tpu.assume_multiple %0, 8 : i32
    %c0 = arith.constant 0 : index
    %c0_0 = arith.constant 0 : index
    %2 = vector.load %arg4[%c0, %c0_0] : memref<16x32xf32, #tpu.memory_space<vmem>>, vector<16x32xf32>
    %3 = arith.index_cast %1 : i32 to index
    %c0_1 = arith.constant 0 : index
    %4 = vector.load %arg4[%3, %c0_1] : memref<16x32xf32, #tpu.memory_space<vmem>>, vector<8x32xf32>
    %c0_2 = arith.constant 0 : index
    %c0_3 = arith.constant 0 : index
    %5 = vector.load %arg1[%c0_2, %c0_3] : memref<8x1xi32, #tpu.memory_space<vmem>>, vector<8x1xi32>
    %c0_4 = arith.constant 0 : index
    %c0_5 = arith.constant 0 : index
    %6 = vector.load %arg2[%c0_4, %c0_5] : memref<1x16xi32, #tpu.memory_space<vmem>>, vector<1x16xi32>
    %c0_6 = arith.constant 0 : index
    %c0_7 = arith.constant 0 : index
    %7 = vector.load %arg3[%c0_6, %c0_7] : memref<1x16xf32, #tpu.memory_space<vmem>>, vector<1x16xf32>
    %cst = arith.constant dense<0.000000e+00> : vector<8x16xf32>
    %8 = tpu.matmul %4, %2, %cst {dimension_numbers = #tpu.dot_dimension_numbers<[1], [1], [0], [0], [0, 0, 1, 0], [], []>} : vector<8x32xf32>, vector<16x32xf32>, vector<8x16xf32> -> vector<8x16xf32>
    %9 = arith.mulf %4, %4 : vector<8x32xf32>
    %cst_8 = arith.constant dense<0.000000e+00> : vector<8xf32>
    %10 = vector.multi_reduction <add>, %9, %cst_8 [1] : vector<8x32xf32> to vector<8xf32>
    %11 = vector.shape_cast %10 : vector<8xf32> to vector<8x1xf32>
    %12 = tpu.iota {dimensions = array<i32: 1>} : vector<8x16xi32>
    %c16_i32 = arith.constant 16 : i32
    %13 = vector.broadcast %c16_i32 : i32 to vector<8x16xi32>
    %14 = arith.cmpi slt, %12, %13 : vector<8x16xi32>
    %15 = vector.broadcast %5 : vector<8x1xi32> to vector<8x16xi32>
    %16 = vector.broadcast %6 : vector<1x16xi32> to vector<8x16xi32>
    %17 = arith.cmpi eq, %15, %16 : vector<8x16xi32>
    %cst_9 = arith.constant 0.999989986 : f32
    %18 = vector.broadcast %cst_9 : f32 to vector<8x16xf32>
    %19 = arith.cmpf olt, %8, %18 : vector<8x16xf32>
    %20 = arith.andi %17, %19 : vector<8x16xi1>
    %21 = arith.andi %20, %14 : vector<8x16xi1>
    %cst_10 = arith.constant dense<true> : vector<8x16xi1>
    %22 = arith.xori %17, %cst_10 : vector<8x16xi1>
    %23 = arith.andi %22, %14 : vector<8x16xi1>
    %cst_11 = arith.constant 1.000000e+30 : f32
    %24 = vector.broadcast %cst_11 : f32 to vector<8x16xf32>
    %25 = arith.select %21, %8, %24 : vector<8x16xi1>, vector<8x16xf32>
    %cst_12 = arith.constant dense<0x7F800000> : vector<8xf32>
    %26 = vector.multi_reduction <minimumf>, %25, %cst_12 [1] : vector<8x16xf32> to vector<8xf32>
    %27 = vector.shape_cast %26 : vector<8xf32> to vector<8x1xf32>
    %cst_13 = arith.constant -1.000000e+30 : f32
    %28 = vector.broadcast %cst_13 : f32 to vector<8x16xf32>
    %29 = arith.select %23, %8, %28 : vector<8x16xi1>, vector<8x16xf32>
    %cst_14 = arith.constant dense<0xFF800000> : vector<8xf32>
    %30 = vector.multi_reduction <maximumf>, %29, %cst_14 [1] : vector<8x16xf32> to vector<8xf32>
    %31 = vector.shape_cast %30 : vector<8xf32> to vector<8x1xf32>
    %cst_15 = arith.constant 1.000000e-01 : f32
    %32 = vector.broadcast %cst_15 : f32 to vector<8x16xf32>
    %33 = arith.addf %8, %32 : vector<8x16xf32>
    %34 = vector.broadcast %27 : vector<8x1xf32> to vector<8x16xf32>
    %35 = arith.cmpf ogt, %33, %34 : vector<8x16xf32>
    %36 = arith.andi %23, %35 : vector<8x16xi1>
    %cst_16 = arith.constant 1.000000e-01 : f32
    %37 = vector.broadcast %cst_16 : f32 to vector<8x16xf32>
    %38 = arith.subf %8, %37 : vector<8x16xf32>
    %39 = vector.broadcast %31 : vector<8x1xf32> to vector<8x16xf32>
    %40 = arith.cmpf olt, %38, %39 : vector<8x16xf32>
    %41 = arith.andi %21, %40 : vector<8x16xi1>
    %cst_17 = arith.constant 1.000000e+30 : f32
    %42 = vector.broadcast %cst_17 : f32 to vector<8x16xf32>
    %43 = arith.select %41, %8, %42 : vector<8x16xi1>, vector<8x16xf32>
    %cst_18 = arith.constant dense<0x7F800000> : vector<8xf32>
    %44 = vector.multi_reduction <minimumf>, %43, %cst_18 [1] : vector<8x16xf32> to vector<8xf32>
    %45 = vector.shape_cast %44 : vector<8xf32> to vector<8x1xf32>
    %cst_19 = arith.constant 5.000000e+29 : f32
    %46 = vector.broadcast %cst_19 : f32 to vector<8x1xf32>
    %47 = arith.cmpf olt, %45, %46 : vector<8x1xf32>
    %cst_20 = arith.constant -5.000000e+29 : f32
    %48 = vector.broadcast %cst_20 : f32 to vector<8x1xf32>
    %49 = arith.cmpf ogt, %31, %48 : vector<8x1xf32>
    %cst_21 = arith.constant 1.000000e-01 : f32
    %50 = vector.broadcast %cst_21 : f32 to vector<8x1xf32>
    %51 = arith.addf %31, %50 : vector<8x1xf32>
    %52 = arith.cmpf ogt, %51, %27 : vector<8x1xf32>
    %53 = arith.andi %49, %52 : vector<8x1xi1>
    %54 = arith.sitofp %12 : vector<8x16xi32> to vector<8x16xf32>
    %55 = vector.broadcast %45 : vector<8x1xf32> to vector<8x16xf32>
    %56 = arith.cmpf oeq, %43, %55 : vector<8x16xf32>
    %57 = arith.andi %41, %56 : vector<8x16xi1>
    %cst_22 = arith.constant 1.600000e+01 : f32
    %58 = vector.broadcast %cst_22 : f32 to vector<8x16xf32>
    %59 = arith.select %57, %54, %58 : vector<8x16xi1>, vector<8x16xf32>
    %cst_23 = arith.constant dense<0x7F800000> : vector<8xf32>
    %60 = vector.multi_reduction <minimumf>, %59, %cst_23 [1] : vector<8x16xf32> to vector<8xf32>
    %61 = vector.shape_cast %60 : vector<8xf32> to vector<8x1xf32>
    %62 = vector.broadcast %61 : vector<8x1xf32> to vector<8x16xf32>
    %63 = arith.cmpf oeq, %54, %62 : vector<8x16xf32>
    %64 = arith.extui %63 : vector<8x16xi1> to vector<8x16xi32>
    %65 = arith.sitofp %64 : vector<8x16xi32> to vector<8x16xf32>
    %cst_24 = arith.constant dense<0.000000e+00> : vector<8x32xf32>
    %66 = tpu.matmul %65, %2, %cst_24 {dimension_numbers = #tpu.dot_dimension_numbers<[1], [0], [0], [1], [0, 0, 1, 1], [], []>} : vector<8x16xf32>, vector<16x32xf32>, vector<8x32xf32> -> vector<8x32xf32>
    %cst_25 = arith.constant dense<0.000000e+00> : vector<8x16xf32>
    %67 = tpu.matmul %66, %2, %cst_25 {dimension_numbers = #tpu.dot_dimension_numbers<[1], [1], [0], [0], [0, 0, 1, 0], [], []>} : vector<8x32xf32>, vector<16x32xf32>, vector<8x16xf32> -> vector<8x16xf32>
    %cst_26 = arith.constant 0.000000e+00 : f32
    %68 = vector.broadcast %cst_26 : f32 to vector<8x1xf32>
    %69 = arith.select %47, %45, %68 : vector<8x1xi1>, vector<8x1xf32>
    %70 = arith.mulf %66, %66 : vector<8x32xf32>
    %cst_27 = arith.constant dense<0.000000e+00> : vector<8xf32>
    %71 = vector.multi_reduction <add>, %70, %cst_27 [1] : vector<8x32xf32> to vector<8xf32>
    %72 = vector.shape_cast %71 : vector<8xf32> to vector<8x1xf32>
    %73 = arith.subf %67, %8 : vector<8x16xf32>
    %74 = vector.broadcast %69 : vector<8x1xf32> to vector<8x16xf32>
    %75 = arith.subf %73, %74 : vector<8x16xf32>
    %76 = vector.broadcast %11 : vector<8x1xf32> to vector<8x16xf32>
    %77 = arith.addf %75, %76 : vector<8x16xf32>
    %cst_28 = arith.constant 2.000000e+00 : f32
    %78 = vector.broadcast %cst_28 : f32 to vector<8x16xf32>
    %79 = arith.mulf %78, %8 : vector<8x16xf32>
    %80 = vector.broadcast %7 : vector<1x16xf32> to vector<8x16xf32>
    %81 = arith.subf %80, %79 : vector<8x16xf32>
    %82 = vector.broadcast %11 : vector<8x1xf32> to vector<8x16xf32>
    %83 = arith.addf %81, %82 : vector<8x16xf32>
    %cst_29 = arith.constant 2.000000e+00 : f32
    %84 = vector.broadcast %cst_29 : f32 to vector<8x1xf32>
    %85 = arith.mulf %84, %69 : vector<8x1xf32>
    %86 = arith.subf %72, %85 : vector<8x1xf32>
    %87 = arith.addf %86, %11 : vector<8x1xf32>
    %cst_30 = arith.constant 1.000000e-16 : f32
    %88 = vector.broadcast %cst_30 : f32 to vector<8x16xf32>
    %89 = arith.maximumf %83, %88 : vector<8x16xf32>
    %cst_31 = arith.constant 1.000000e-16 : f32
    %90 = vector.broadcast %cst_31 : f32 to vector<8x1xf32>
    %91 = arith.maximumf %87, %90 : vector<8x1xf32>
    %92 = vector.broadcast %91 : vector<8x1xf32> to vector<8x16xf32>
    %93 = arith.mulf %89, %92 : vector<8x16xf32>
    %94 = math.rsqrt %93 : vector<8x16xf32>
    %cst_32 = arith.constant 3.000000e-01 : f32
    %95 = vector.broadcast %cst_32 : f32 to vector<8x16xf32>
    %96 = arith.mulf %95, %77 : vector<8x16xf32>
    %97 = arith.mulf %96, %94 : vector<8x16xf32>
    %cst_33 = arith.constant 0.699999988 : f32
    %98 = vector.broadcast %cst_33 : f32 to vector<8x16xf32>
    %99 = arith.subf %8, %98 : vector<8x16xf32>
    %cst_34 = arith.constant -2.000000e+00 : f32
    %100 = vector.broadcast %cst_34 : f32 to vector<8x16xf32>
    %101 = arith.mulf %100, %99 : vector<8x16xf32>
    %102 = math.exp %101 : vector<8x16xf32>
    %cst_35 = arith.constant 0.000000e+00 : f32
    %103 = vector.broadcast %cst_35 : f32 to vector<8x16xf32>
    %104 = arith.select %41, %102, %103 : vector<8x16xi1>, vector<8x16xf32>
    %cst_36 = arith.constant dense<0.000000e+00> : vector<8xf32>
    %105 = vector.multi_reduction <add>, %104, %cst_36 [1] : vector<8x16xf32> to vector<8xf32>
    %106 = vector.shape_cast %105 : vector<8xf32> to vector<8x1xf32>
    %cst_37 = arith.constant 1.000000e+00 : f32
    %107 = vector.broadcast %cst_37 : f32 to vector<8x1xf32>
    %108 = arith.addf %107, %106 : vector<8x1xf32>
    %109 = math.log %108 : vector<8x1xf32>
    %cst_38 = arith.constant 5.000000e-01 : f32
    %110 = vector.broadcast %cst_38 : f32 to vector<8x1xf32>
    %111 = arith.mulf %110, %109 : vector<8x1xf32>
    %cst_39 = arith.constant 0.699999988 : f32
    %112 = vector.broadcast %cst_39 : f32 to vector<8x16xf32>
    %113 = arith.subf %8, %112 : vector<8x16xf32>
    %114 = arith.subf %113, %97 : vector<8x16xf32>
    %cst_40 = arith.constant 5.000000e+01 : f32
    %115 = vector.broadcast %cst_40 : f32 to vector<8x16xf32>
    %116 = arith.mulf %115, %114 : vector<8x16xf32>
    %cst_41 = arith.constant 8.000000e+01 : f32
    %117 = vector.broadcast %cst_41 : f32 to vector<8x16xf32>
    %118 = arith.minimumf %116, %117 : vector<8x16xf32>
    %119 = math.exp %118 : vector<8x16xf32>
    %cst_42 = arith.constant 0.000000e+00 : f32
    %120 = vector.broadcast %cst_42 : f32 to vector<8x16xf32>
    %121 = arith.select %36, %119, %120 : vector<8x16xi1>, vector<8x16xf32>
    %cst_43 = arith.constant dense<0.000000e+00> : vector<8xf32>
    %122 = vector.multi_reduction <add>, %121, %cst_43 [1] : vector<8x16xf32> to vector<8xf32>
    %123 = vector.shape_cast %122 : vector<8xf32> to vector<8x1xf32>
    %cst_44 = arith.constant 1.000000e+00 : f32
    %124 = vector.broadcast %cst_44 : f32 to vector<8x1xf32>
    %125 = arith.addf %124, %123 : vector<8x1xf32>
    %126 = math.log %125 : vector<8x1xf32>
    %cst_45 = arith.constant 2.000000e-02 : f32
    %127 = vector.broadcast %cst_45 : f32 to vector<8x1xf32>
    %128 = arith.mulf %127, %126 : vector<8x1xf32>
    %129 = tpu.iota {dimensions = array<i32: 0>} : vector<8x1xi32>
    %130 = vector.broadcast %1 : i32 to vector<8x1xi32>
    %131 = arith.addi %130, %129 : vector<8x1xi32>
    %c16_i32_46 = arith.constant 16 : i32
    %132 = vector.broadcast %c16_i32_46 : i32 to vector<8x1xi32>
    %133 = arith.cmpi slt, %131, %132 : vector<8x1xi32>
    %134 = arith.andi %47, %53 : vector<8x1xi1>
    %135 = arith.andi %134, %133 : vector<8x1xi1>
    %136 = arith.addf %111, %128 : vector<8x1xf32>
    %cst_47 = arith.constant 0.000000e+00 : f32
    %137 = vector.broadcast %cst_47 : f32 to vector<8x1xf32>
    %138 = arith.select %135, %136, %137 : vector<8x1xi1>, vector<8x1xf32>
    %c0_48 = arith.constant 0 : index
    %c0_49 = arith.constant 0 : index
    %139 = vector.load %arg5[%c0_48, %c0_49] : memref<8x1xf32, #tpu.memory_space<vmem>>, vector<8x1xf32>
    tpu.vector_store %arg5[%c0_48, %c0_49], %138 {strides = array<i32>} : memref<8x1xf32, #tpu.memory_space<vmem>>, vector<8x1xf32>,
    return
  }
  func.func @transform_0(%arg0: i32) -> (i32, i32) {
    %c0_i32 = arith.constant 0 : i32
    %c0_i32_0 = arith.constant 0 : i32
    return %arg0, %c0_i32 : i32, i32
  }
  func.func @transform_1(%arg0: i32) -> (i32, i32) {
    %c0_i32 = arith.constant 0 : i32
    %c0_i32_0 = arith.constant 0 : i32
    %c0_i32_1 = arith.constant 0 : i32
    return %c0_i32, %c0_i32_0 : i32, i32
  }
  func.func @transform_2(%arg0: i32) -> (i32, i32) {
    %c0_i32 = arith.constant 0 : i32
    %c0_i32_0 = arith.constant 0 : i32
    %c0_i32_1 = arith.constant 0 : i32
    return %c0_i32, %c0_i32_0 : i32, i32
  }
  func.func @transform_3(%arg0: i32) -> (i32, i32) {
    %c0_i32 = arith.constant 0 : i32
    %c0_i32_0 = arith.constant 0 : i32
    %c0_i32_1 = arith.constant 0 : i32
    return %c0_i32, %c0_i32_0 : i32, i32
  }
  func.func @transform_4(%arg0: i32) -> (i32, i32) {
    %c0_i32 = arith.constant 0 : i32
    %c0_i32_0 = arith.constant 0 : i32
    return %arg0, %c0_i32 : i32, i32
  }
}

</mosaic_0001>

<bundles_post_ra>
// kernel: tpu_custom_call.1
= control target key start
LH: loop header
LB: loop body
LE: loop exit
PB: predicated region body
PF: predicated region fallthrough
CT: control target
= control target key end

     0   :  { %s723_s15 = smov 0   ;;  %s838_s0 = inlined_call_operand.vmem [shape: s32[16,1], index: 0, kind: input, shape index: {}]   ;;  %s839_s1 = inlined_call_operand.vmem [shape: s32[1,16], index: 1, kind: input, shape index: {}]   ;;  %s840_s2 = inlined_call_operand.vmem [shape: f32[1,16], index: 2, kind: input, shape index: {}]   ;;  %s841_s3 = inlined_call_operand.vmem [shape: f32[16,32], index: 3, kind: input, shape index: {}]   ;;  %s842_s4 = inlined_call_operand.vmem [shape: f32[16,1], index: 4, kind: output, shape index: {}]  }
   0x1 LB: > { %s729_s16 = sadd.s32 4294967295, %s691_s15   ;;  %p602_p0 = scmp.ge.s32.totalorder %s691_s15, 1  ;;  %s691_s15 = sphi %s723_s15, %s14_s15  }
   0x2   : > { %p161_p1 = scmp.lt.s32.totalorder %s691_s15, 3 }
   0x4   : > { %p162_p2 = pnand %p602_p0, %p161_p1 }
   0x5   : > { %v194_v0 = vld [vmem:[%s841_s3] sm:$0xff] (!%p162_p2)  ;;  %v195_v1 = vld [vmem:[%s841_s3 + $0x8] sm:$0xff] (!%p162_p2)  ;;  %vm201_vm0 = vcmask (!%p162_p2), 261120   ;;  %v693_v2 = vmov (!%p162_p2), 0.0|0.0   ;;  %vm694_vm2 = vmmov (!%p162_p2), 0   ;;  %v695_v5 = vmov (!%p162_p2), 0.0  }
   0x6   : > { %165 = sbr.rel (%p162_p2) target bundleno = 1283 (0x503), region = 36  ;;  %650 = vmatprep.subr.bf16.mxu0 (!%p162_p2), %v693_v2  ;;  %v651_v3 = vpack.c.bf16 (!%p162_p2), %v195_v1, %v194_v0  ;;  %vm741_vm1 = vmpackc.low (!%p162_p2), %vm201_vm0, %vm201_vm0  ;;  %633 = vmatprep.mubr.msk.f32.mxu0 (!%p162_p2), %vm694_vm2, %v695_v5  ;;  %s605_s21 = sshll.u32 (!%p162_p2), %s729_s16, 3  ;;  %v696_v6 = vmov (!%p162_p2), 0   ;;  %v285_v9 = vlaneseq (!%p162_p2)  ;;  %v609_v10 = vld [vmem:[%s839_s1] ss:$0 sm:$0xff] (!%p162_p2)  ;;  %vm697_vm4 = vmmov (!%p162_p2), 1  }
   0x7   : > { %p185_p3 = scmp.lt.s32.totalorder (!%p162_p2), %s729_s16, 1  ;;  %674 = vset.pattern.permute.xlu0 (!%p162_p2), %v696_v6  ;;  %654 = vmatprep.subr.bf16.mxu1 (!%p162_p2), %v693_v2  ;;  %s196_s25 = scalar_lea.vmem (!%p162_p2), %s841_s3, %s605_s21  ;;  %vm302_vm8 = vcmask (!%p162_p2), 130048   ;;  %v534_v46 = vstv (!%p162_p2), %s605_s21  ;;  %v616_v54 = vld [vmem:[%s840_s2] ss:$0 sm:$0xff] (!%p162_p2) }
   0x8   : > { %653 = vmatpush3.bf16.xpose.msk.msra.mxu0 (!%p162_p2), %vm741_vm1, %v651_v3  ;;  %656 = vmatpush3.bf16.msra.mxu1 (!%p162_p2), %v651_v3  ;;  %v197_v7 = vld [vmem:[%s196_s25] sm:$0xff] (!%p162_p2)  ;;  %v286_v12 = vand.u32 (!%p162_p2), 127, %v285_v9  ;;  %v533_v45 = vshrl.u32 (!%p162_p2), %v285_v9, 7 }
   0x9   : > { %640 = vmatprep.mubr.msk.f32.mxu1 (!%p162_p2), %vm694_vm2, %v695_v5  ;;  %657 = vmatprep.subr.bf16.mxu1 (!%p162_p2), %v693_v2  ;;  %v281_v36 = vmul.f32 (!%p162_p2), %v197_v7, %v197_v7 }
   0xa   : > { %vm287_vm6 = vcmp.lt.s32.totalorder (!%p162_p2), %v286_v12, 16  ;;  %v325_v24 = vcvt.s32.f32 (!%p162_p2), %v286_v12  ;;  %v535_v48 = vadd.s32 (!%p162_p2), %v534_v46, %v533_v45 }
   0xb   : > { %v282_v38 = vsel (!%p162_p2), %vm201_vm0, %v281_v36, 0.0 }
   0xd   : > { %s751_s22 = scalar_select %p185_p3, %s729_s16, 1 }
   0xf   : > { %s603_s26 = sshll.u32 %s751_s22, 3  ;;  %634 = vmatmul.mubr.msk.f32.vlgmr.msra.gmra.mrb[0].mxu0 %vm201_vm0, %v197_v7 }
  0x10   : > { %s188_s29 = scalar_lea.vmem %s838_s0, %s603_s26  ;;  %s192_s10 = scalar_lea.vmem %s842_s4, %s603_s26 }
  0x11   : > { %v198_v8 = vld [vmem:[%s188_s29] sm:$0xff] }
  0x12   : > { %289 = vperm.xlu0 %674, %v198_v8  }
  0x91   : > { %v290_v11 = vpop.permute.xlu0 %289 }
  0x92   : > { %vm295_vm3 = vcmp.eq.s32.totalorder %v290_v11, %v609_v10 }
  0x93   : > { %vm299_vm5 = vmxor %vm295_vm3, %vm697_vm4 }
  0x94   : > { %vm769_vm7 = vmand %vm299_vm5, %vm287_vm6 }
  0xe2   : > { %v773_v14 = vpop.f32.mrb[0].mxu0 }
  0xe3   : > { %v635_v15 = vpop.f32.mrb[1].mxu0  ;;  %v306_v16 = vsel %vm769_vm7, %v773_v14, -1e+30  ;;  %vm296_vm9 = vcmp.lt.f32.partialorder %v773_v14, 0.99999  ;;  %v489_v53 = vmul.f32 2.0, %v773_v14 }
  0xe4   : > { %v307_v17 = vsel %vm302_vm8, %v306_v16, -inf  ;;  %vm297_vm10 = vmand %vm295_vm3, %vm296_vm9  ;;  %v610_v18 = vadd.f32 -0.1, %v773_v14  ;;  %v617_v30 = vadd.f32 -0.7, %v773_v14 }
  0xe5   : > { %308 = vmax.xlane.f32.xlu0 %v307_v17  ;;  %vm781_vm11 = vmand %vm297_vm10, %vm287_vm6  ;;  %v496_v57 = vsub.f32 %v616_v54, %v489_v53  ;;  %v310_v11 = vadd.f32 0.1, %v773_v14 }
  0xe6   : > { %v508_v31 = vmul.f32 -2.0, %v617_v30  ;;  %v301_v39 = vsel %vm781_vm11, %v773_v14, 1e+30 }
  0xe7   : > { %v303_v41 = vsel %vm302_vm8, %v301_v39, inf }
  0xe8   : > { %v509_v32 = vmul.f32 1.442695, %v508_v31 }
  0xea   : > { %675 = vpow2.f32 %v509_v32 }
  0xf4   : > { %v676_v40 = vpop.eup %675 }
 0x172   : > { %v309_v19 = vpop.xlane.xlu0 %308 }
 0x173   : > { %vm314_vm12 = vcmp.lt.f32.partialorder %v610_v18, %v309_v19  ;;  %v322_v49 = vadd.f32 0.1, %v309_v19 }
 0x174   : > { %vm787_vm13 = vmand %vm781_vm11, %vm314_vm12 }
 0x175   : > { %v316_v22 = vsel %vm787_vm13, %v773_v14, 1e+30  ;;  %v511_v42 = vsel %vm787_vm13, %v676_v40, 0.0 }
 0x176   : > { %v317_v23 = vsel %vm302_vm8, %v316_v22, inf  ;;  %v512_v43 = vsel %vm302_vm8, %v511_v42, 0.0 }
 0x177   : > { %318 = vmin.xlane.f32.xlu1 %v317_v23 }
 0x204   : > { %v319_v25 = vpop.xlane.xlu1 %318 }
 0x205   : > { %vm326_vm14 = vcmp.eq.f32.partialorder %v316_v22, %v319_v25  ;;  %vm320_vm4 = vcmp.lt.f32.partialorder %v319_v25, 5e+29 }
 0x206   : > { %vm327_vm15 = vmand %vm787_vm13, %vm326_vm14  ;;  %v481_v52 = vsel %vm320_vm4, %v319_v25, 0.0 }
 0x207   : > { %v328_v26 = vsel %vm327_vm15, %v325_v24, 16.0  ;;  %v498_v55 = vmul.f32 2.0, %v481_v52 }
 0x208   : > { %v329_v27 = vsel %vm302_vm8, %v328_v26, inf }
 0x209   : > { %330 = vmin.xlane.f32.xlu1 %v329_v27 }
 0x296   : > { %v331_v28 = vpop.xlane.xlu1 %330 }
 0x297   : > { %vm332_vm3 = vcmp.eq.f32.partialorder %v325_v24, %v331_v28 }
 0x298   : > { %v611_v29 = vsel %vm332_vm3, 1.0, %v695_v5 }
 0x299   : > { %641 = vmatmul.mubr.msk.f32.vlgmr.msra.gmra.mrb[0].mxu1 %vm302_vm8, %v611_v29 }
 0x29a   : > { %660 = vmatpush3.bf16.xpose.msk.msra.mxu1 %vm741_vm1, %v651_v3  ;;  %647 = vmatprep.mubr.msk.f32.mxu1 %vm694_vm2, %v695_v5  ;;  %vm536_vm1 = vcmp.lt.s32.totalorder %v535_v48, 16 }
 0x36c   : > { %v404_v33 = vpop.f32.mrb[0].mxu1 }
 0x36d   : > { %v482_v34 = vmul.f32 %v404_v33, %v404_v33  ;;  %v642_v35 = vpop.f32.mrb[1].mxu1  ;;  %648 = vmatmul.mubr.msk.f32.vlgmr.msra.gmra.mrb[2].mxu1 %vm201_vm0, %v404_v33 }
 0x36f   : > { %v483_v37 = vsel %vm201_vm0, %v482_v34, 0.0  ;;  %vm321_vm0 = vcmp.gt.f32.partialorder %v309_v19, -5e+29 }
 0x370   : > { %484 = vadd.xlane.f32.xlu1 %v483_v37 }
 0x374   : > { %283 = vadd.xlane.f32.xlu1 %v282_v38 }
 0x378   : > { %304 = vmin.xlane.f32.xlu1 %v303_v41 }
 0x37c   : > { %513 = vadd.xlane.f32.xlu1 %v512_v43 }
 0x3fd   : > { %v485_v44 = vpop.xlane.xlu1 %484 }
 0x3fe   : > { %v499_v56 = vsub.f32 %v485_v44, %v498_v55 }
 0x401   : > { %v284_v47 = vpop.xlane.xlu1 %283 }
 0x402   : > { %v497_v58 = vadd.f32 %v496_v57, %v284_v47  ;;  %v500_v59 = vadd.f32 %v499_v56, %v284_v47 }
 0x404   : > { %v501_v60 = vmax.f32 %v497_v58, 1e-16  ;;  %v502_v61 = vmax.f32 %v500_v59, 1e-16 }
 0x405   : > { %v305_v50 = vpop.xlane.xlu1 %304 }
 0x406   : > { %vm323_vm2 = vcmp.gt.f32.partialorder %v322_v49, %v305_v50  ;;  %v503_v62 = vmul.f32 %v502_v61, %v501_v60  ;;  %vm311_vm10 = vcmp.gt.f32.partialorder %v310_v11, %v305_v50 }
 0x407   : > { %vm324_vm5 = vmand %vm321_vm0, %vm323_vm2 }
 0x408   : > { %vm537_vm6 = vmand %vm320_vm4, %vm324_vm5  ;;  %677 = vrsqrt.f32 %v503_v62 }
 0x409   : > { %vm815_vm9 = vmand %vm537_vm6, %vm536_vm1  ;;  %v514_v17 = vpop.xlane.xlu1 %513 }
 0x40a   : > { %vm312_vm11 = vmand %vm769_vm7, %vm311_vm10  ;;  %v515_v18 = vadd.f32 1.0, %v514_v17  ;;  %vm541_vm7 = vcmask 7168  }
 0x412   : > { %v678_v5 = vpop.eup %677 }
 0x440   : > { %v477_v63 = vpop.f32.mrb[2].mxu1 }
 0x441   : > { %v486_v0 = vsub.f32 %v477_v63, %v773_v14  ;;  %v649_v1 = vpop.f32.mrb[3].mxu1 }
 0x443   : > { %v487_v2 = vsub.f32 %v486_v0, %v481_v52 }
 0x445   : > { %v488_v3 = vadd.f32 %v487_v2, %v284_v47 }
 0x447   : > { %v505_v4 = vmul.f32 0.3, %v488_v3 }
 0x449   : > { %v506_v6 = vmul.f32 %v678_v5, %v505_v4 }
 0x44b   : > { %v519_v7 = vsub.f32 %v617_v30, %v506_v6 }
 0x44d   : > { %v520_v8 = vmul.f32 50.0, %v519_v7 }
 0x44f   : > { %v521_v9 = vmin.f32 %v520_v8, 80.0 }
 0x451   : > { %v522_v10 = vmul.f32 1.442695, %v521_v9 }
 0x453   : > { %679 = vpow2.f32 %v522_v10 }
 0x454   : > { %681 = vlog2.f32 %v515_v18 }
 0x45d   : > { %v680_v12 = vpop.eup %679 }
 0x45e   : > { %v524_v15 = vsel %vm312_vm11, %v680_v12, 0.0  ;;  %v682_v21 = vpop.eup %681 }
 0x45f   : > { %v525_v16 = vsel %vm302_vm8, %v524_v15, 0.0  ;;  %v517_v22 = vmul.f32 0.6931472, %v682_v21 }
 0x460   : > { %526 = vadd.xlane.f32.xlu1 %v525_v16 }
 0x461   : > { %v518_v24 = vmul.f32 0.5, %v517_v22 }
 0x4ed   : > { %v527_v19 = vpop.xlane.xlu1 %526 }
 0x4ee   : > { %v528_v20 = vadd.f32 1.0, %v527_v19 }
 0x4f0   : > { %683 = vlog2.f32 %v528_v20 }
 0x4fa   : > { %v684_v23 = vpop.eup %683 }
 0x4fb   : > { %v530_v14 = vmul.f32 0.6931472, %v684_v23 }
 0x4fd   : > { %v531_v25 = vmul.f32 0.02, %v530_v14 }
 0x4ff   : > { %v539_v13 = vadd.f32 %v531_v25, %v518_v24 }
 0x501   : > { %v540_v26 = vsel %vm815_vm9, %v539_v13, 0.0 }
 0x502   : > { %542 = vst.msk [vmem:[%s192_s10] sm:$0xff] %vm541_vm7, %v540_v26 }
 0x503 PF: > { %s14_s15 = sadd.s32 1, %s691_s15  }
 0x504   : > { %p11_p4 = scmp.ge.s32.totalorder %s14_s15, 4  }
 0x506   :  { %13 = sbr.rel (!%p11_p4) target bundleno = 1 (0x1), region = 67 }

</bundles_post_ra>
